<compile_context>
chip_gen: v7x
topology: tpu7x:2x2x1
jax: 0.10.0
libtpu: 0.0.40
codegen_flags: <defaults>
</compile_context>

<pallas_src>
import jax
import jax.numpy as jnp
from jax.experimental import pallas as pl
from jax.experimental.pallas import tpu as pltpu


def _round_up(n: int, m: int) -> int:
    return ((n + m - 1) // m) * m


def policy_mlp_kernel(x_ref, w1_ref, b1_ref, w2_ref, b2_ref, o_ref):
    # Fused: hidden = relu(x @ W1 + b1); logits = hidden @ W2 + b2; out = softmax(logits)
    x = x_ref[...]                                                       # (TB, D_in)
    h = jnp.dot(x, w1_ref[...], preferred_element_type=jnp.float32) + b1_ref[...]
    h = jnp.maximum(h, 0.0)                                              # ReLU
    logits = jnp.dot(h, w2_ref[...], preferred_element_type=jnp.float32) + b2_ref[...]
    # Row-wise softmax over the (exact) A action lanes; exact divide so rows sum to 1.
    m = jnp.max(logits, axis=-1, keepdims=True)
    e = jnp.exp(logits - m)
    denom = jnp.sum(e, axis=-1, keepdims=True)
    o_ref[...] = (e / denom).astype(o_ref.dtype)


def policy_network_forward(x, w1, b1, w2, b2, *, block_b: int = 1024):
    """x: (B, D_in) f32; w1: (D_in, H); b1: (1, H); w2: (H, A); b2: (1, A)."""
    B, D_in = x.shape
    H = w1.shape[1]
    A = w2.shape[1]

    # Balanced batch tiling: <8 rows of waste, >=2 blocks when B > 8 (v7x megacore).
    if B <= 8:
        TB = B
    else:
        num_blocks = max(2, pl.cdiv(B, block_b))
        TB = _round_up(pl.cdiv(B, num_blocks), 8)
    grid = (pl.cdiv(B, TB),)

    cost = pl.CostEstimate(
        flops=2 * B * (D_in * H + H * A) + 5 * B * A + B * H,
        transcendentals=B * A,
        bytes_accessed=4 * (B * D_in + B * A + D_in * H + H + H * A + A),
    )

    return pl.pallas_call(
        policy_mlp_kernel,
        out_shape=jax.ShapeDtypeStruct((B, A), jnp.float32),
        grid=grid,
        in_specs=[
            pl.BlockSpec((TB, D_in), lambda i: (i, 0)),   # streamed activations
            pl.BlockSpec((D_in, H), lambda i: (0, 0)),    # resident weights / biases
            pl.BlockSpec((1, H), lambda i: (0, 0)),
            pl.BlockSpec((H, A), lambda i: (0, 0)),
            pl.BlockSpec((1, A), lambda i: (0, 0)),
        ],
        out_specs=pl.BlockSpec((TB, A), lambda i: (i, 0)),
        compiler_params=pltpu.CompilerParams(
            dimension_semantics=("parallel",),            # shard batch across TCs (v7x)
        ),
        cost_estimate=cost,
    )(x.astype(jnp.float32), w1, b1, w2, b2)


def _reference(x, w1, b1, w2, b2):
    h = jnp.maximum(x @ w1 + b1, 0.0)
    return jax.nn.softmax(h @ w2 + b2, axis=-1)


if __name__ == "__main__":
    # Small shapes consistent with a gym-style policy net:
    #   state_space.high.shape[0] = 4 (e.g. CartPole), action_space.n = 8, hidden = 32
    batch, state_dim, hidden, n_actions = 2, 4, 32, 8

    key = jax.random.PRNGKey(0)
    k_x, k_w1, k_b1, k_w2, k_b2, k_big = jax.random.split(key, 6)

    # Deterministic parameter init (uniform, roughly matching nn.Linear's scale).
    lim1 = 1.0 / jnp.sqrt(state_dim)
    lim2 = 1.0 / jnp.sqrt(hidden)
    w1 = jax.random.uniform(k_w1, (state_dim, hidden), jnp.float32, -lim1, lim1)
    b1 = jax.random.uniform(k_b1, (1, hidden), jnp.float32, -lim1, lim1)
    w2 = jax.random.uniform(k_w2, (hidden, n_actions), jnp.float32, -lim2, lim2)
    b2 = jax.random.uniform(k_b2, (1, n_actions), jnp.float32, -lim2, lim2)

    x = jax.random.normal(k_x, (batch, state_dim), jnp.float32)

    out = policy_network_forward(x, w1, b1, w2, b2)
    out = jax.block_until_ready(out)

    ref = _reference(x, w1, b1, w2, b2)
    assert out.shape == (batch, n_actions)
    assert jnp.allclose(out, ref, atol=1e-5, rtol=1e-5)
    assert jnp.allclose(jnp.sum(out, axis=-1), 1.0, atol=1e-5)

    # Exercise the multi-block / ragged-last-tile path (grid = 2 for B = 600).
    big_b = 600
    x_big = jax.random.normal(k_big, (big_b, state_dim), jnp.float32)
    out_big = jax.block_until_ready(policy_network_forward(x_big, w1, b1, w2, b2))
    ref_big = _reference(x_big, w1, b1, w2, b2)
    assert out_big.shape == (big_b, n_actions)
    assert jnp.allclose(out_big, ref_big, atol=1e-5, rtol=1e-5)
    assert jnp.allclose(jnp.sum(out_big, axis=-1), 1.0, atol=1e-5)

    print("KERNEL_OK")
</pallas_src>

<mosaic_0001>
module attributes {stable_mosaic.version = 11 : i64} {
  func.func @policy_mlp_kernel(%arg0: i32, %arg1: memref<2x4xf32, #tpu.memory_space<vmem>>, %arg2: memref<4x32xf32, #tpu.memory_space<vmem>>, %arg3: memref<1x32xf32, #tpu.memory_space<vmem>>, %arg4: memref<32x8xf32, #tpu.memory_space<vmem>>, %arg5: memref<1x8xf32, #tpu.memory_space<vmem>>, %arg6: memref<2x8xf32, #tpu.memory_space<vmem>>) attributes {dimension_semantics = [#tpu.dimension_semantics<parallel>], iteration_bounds = array<i64: 1>, scalar_prefetch = 0 : i64, scratch_operands = 0 : i64, tpu.core_type = #tpu.core_type<tc>, window_params = [{transform_indices = @transform_0, window_bounds = array<i64: 2, 4>}, {pipeline_mode = #tpu.pipeline_mode<synchronous>, transform_indices = @transform_1, window_bounds = array<i64: 4, 32>}, {pipeline_mode = #tpu.pipeline_mode<synchronous>, transform_indices = @transform_2, window_bounds = array<i64: 1, 32>}, {pipeline_mode = #tpu.pipeline_mode<synchronous>, transform_indices = @transform_3, window_bounds = array<i64: 32, 8>}, {pipeline_mode = #tpu.pipeline_mode<synchronous>, transform_indices = @transform_4, window_bounds = array<i64: 1, 8>}, {transform_indices = @transform_5, window_bounds = array<i64: 2, 8>}]} {
    %c0 = arith.constant 0 : index
    %c0_0 = arith.constant 0 : index
    %0 = vector.load %arg1[%c0, %c0_0] : memref<2x4xf32, #tpu.memory_space<vmem>>, vector<2x4xf32>
    %c0_1 = arith.constant 0 : index
    %c0_2 = arith.constant 0 : index
    %1 = vector.load %arg2[%c0_1, %c0_2] : memref<4x32xf32, #tpu.memory_space<vmem>>, vector<4x32xf32>
    %cst = arith.constant dense<0.000000e+00> : vector<2x32xf32>
    %2 = tpu.matmul %0, %1, %cst {dimension_numbers = #tpu.dot_dimension_numbers<[1], [0], [0], [1], [0, 0, 1, 1], [], []>} : vector<2x4xf32>, vector<4x32xf32>, vector<2x32xf32> -> vector<2x32xf32>
    %c0_3 = arith.constant 0 : index
    %c0_4 = arith.constant 0 : index
    %3 = vector.load %arg3[%c0_3, %c0_4] : memref<1x32xf32, #tpu.memory_space<vmem>>, vector<1x32xf32>
    %4 = vector.broadcast %3 : vector<1x32xf32> to vector<2x32xf32>
    %5 = arith.addf %2, %4 : vector<2x32xf32>
    %cst_5 = arith.constant 0.000000e+00 : f32
    %6 = vector.broadcast %cst_5 : f32 to vector<2x32xf32>
    %7 = arith.maximumf %5, %6 : vector<2x32xf32>
    %c0_6 = arith.constant 0 : index
    %c0_7 = arith.constant 0 : index
    %8 = vector.load %arg4[%c0_6, %c0_7] : memref<32x8xf32, #tpu.memory_space<vmem>>, vector<32x8xf32>
    %cst_8 = arith.constant dense<0.000000e+00> : vector<2x8xf32>
    %9 = tpu.matmul %7, %8, %cst_8 {dimension_numbers = #tpu.dot_dimension_numbers<[1], [0], [0], [1], [0, 0, 1, 1], [], []>} : vector<2x32xf32>, vector<32x8xf32>, vector<2x8xf32> -> vector<2x8xf32>
    %c0_9 = arith.constant 0 : index
    %c0_10 = arith.constant 0 : index
    %10 = vector.load %arg5[%c0_9, %c0_10] : memref<1x8xf32, #tpu.memory_space<vmem>>, vector<1x8xf32>
    %11 = vector.broadcast %10 : vector<1x8xf32> to vector<2x8xf32>
    %12 = arith.addf %9, %11 : vector<2x8xf32>
    %cst_11 = arith.constant dense<0xFF800000> : vector<2xf32>
    %13 = vector.multi_reduction <maximumf>, %12, %cst_11 [1] : vector<2x8xf32> to vector<2xf32>
    %14 = vector.shape_cast %13 : vector<2xf32> to vector<2x1xf32>
    %15 = vector.broadcast %14 : vector<2x1xf32> to vector<2x8xf32>
    %16 = arith.subf %12, %15 : vector<2x8xf32>
    %17 = math.exp %16 : vector<2x8xf32>
    %cst_12 = arith.constant dense<0.000000e+00> : vector<2xf32>
    %18 = vector.multi_reduction <add>, %17, %cst_12 [1] : vector<2x8xf32> to vector<2xf32>
    %19 = vector.shape_cast %18 : vector<2xf32> to vector<2x1xf32>
    %20 = vector.broadcast %19 : vector<2x1xf32> to vector<2x8xf32>
    %21 = arith.divf %17, %20 : vector<2x8xf32>
    %c0_13 = arith.constant 0 : index
    %c0_14 = arith.constant 0 : index
    %22 = vector.load %arg6[%c0_13, %c0_14] : memref<2x8xf32, #tpu.memory_space<vmem>>, vector<2x8xf32>
    tpu.vector_store %arg6[%c0_13, %c0_14], %21 {strides = array<i32>} : memref<2x8xf32, #tpu.memory_space<vmem>>, vector<2x8xf32>,
    return
  }
  func.func @transform_0(%arg0: i32) -> (i32, i32) {
    %c0_i32 = arith.constant 0 : i32
    %c0_i32_0 = arith.constant 0 : i32
    return %arg0, %c0_i32 : i32, i32
  }
  func.func @transform_1(%arg0: i32) -> (i32, i32) {
    %c0_i32 = arith.constant 0 : i32
    %c0_i32_0 = arith.constant 0 : i32
    %c0_i32_1 = arith.constant 0 : i32
    return %c0_i32, %c0_i32_0 : i32, i32
  }
  func.func @transform_2(%arg0: i32) -> (i32, i32) {
    %c0_i32 = arith.constant 0 : i32
    %c0_i32_0 = arith.constant 0 : i32
    %c0_i32_1 = arith.constant 0 : i32
    return %c0_i32, %c0_i32_0 : i32, i32
  }
  func.func @transform_3(%arg0: i32) -> (i32, i32) {
    %c0_i32 = arith.constant 0 : i32
    %c0_i32_0 = arith.constant 0 : i32
    %c0_i32_1 = arith.constant 0 : i32
    return %c0_i32, %c0_i32_0 : i32, i32
  }
  func.func @transform_4(%arg0: i32) -> (i32, i32) {
    %c0_i32 = arith.constant 0 : i32
    %c0_i32_0 = arith.constant 0 : i32
    %c0_i32_1 = arith.constant 0 : i32
    return %c0_i32, %c0_i32_0 : i32, i32
  }
  func.func @transform_5(%arg0: i32) -> (i32, i32) {
    %c0_i32 = arith.constant 0 : i32
    %c0_i32_0 = arith.constant 0 : i32
    return %arg0, %c0_i32 : i32, i32
  }
}

</mosaic_0001>

<bundles_post_ra>
// kernel: tpu_custom_call.1
= control target key start
LH: loop header
LB: loop body
LE: loop exit
PB: predicated region body
PF: predicated region fallthrough
CT: control target
= control target key end

     0   :  { %vm34_vm0 = vcmask 1043456   ;;  %vm30_vm1 = vcmask 31744   ;;  %v287_v1 = vmov 0.0   ;;  %vm288_vm2 = vmmov 0   ;;  %s360_s0 = inlined_call_operand.vmem [shape: f32[2,4], index: 0, kind: input, shape index: {}]   ;;  %s361_s1 = inlined_call_operand.vmem [shape: f32[4,32], index: 1, kind: input, shape index: {}]   ;;  %s362_s2 = inlined_call_operand.vmem [shape: f32[1,32], index: 2, kind: input, shape index: {}]   ;;  %s363_s3 = inlined_call_operand.vmem [shape: f32[32,8], index: 3, kind: input, shape index: {}]   ;;  %s364_s4 = inlined_call_operand.vmem [shape: f32[1,8], index: 4, kind: input, shape index: {}]   ;;  %s365_s5 = inlined_call_operand.hbm [shape: f32[2,8], index: 5, kind: output, shape index: {}]  }
   0x1   :  { %v22_v0 = vld [vmem:[%s361_s1] sm:$0xf]  ;;  %233 = vmatprep.subr.mxu0 %v287_v1  ;;  %235 = vmatprep.mubr.msk.f32.mxu0 %vm288_vm2, %v287_v1  ;;  %v110_v4 = vld [vmem:[%s363_s3 + $0x8] sm:$0xff]  ;;  %v289_v5 = vmov 0.0|0.0  }
   0x2   :  { %v21_v2 = vld [vmem:[%s360_s0] sm:$0x3]  ;;  %234 = vmatpush3.msk.msra.mxu0 %vm34_vm0, %v22_v0  ;;  %249 = vmatprep.subr.bf16.mxu1 %v289_v5 }
   0x3   :  { %v109_v3 = vld [vmem:[%s363_s3] sm:$0xff] }
   0x4   :  { %v250_v6 = vpack.c.bf16 %v110_v4, %v109_v3 }
   0x5   :  { %10 = vsyncpa [#allocation3], 0  ;;  %236 = vmatmul.mubr.msk.f32.vlgmr.msra.gmra.mrb[0].mxu0 %vm30_vm1, %v21_v2  ;;  %246 = vmatprep.mubr.msk.f32.mxu1 %vm288_vm2, %v287_v1  ;;  %v111_v7 = vld [vmem:[%s363_s3 + $0x10] sm:$0xff]  ;;  %v112_v8 = vld [vmem:[%s363_s3 + $0x18] sm:$0xff]  ;;  %vm120_vm3 = vcmask 261120   ;;  %vm194_vm4 = vcmask 58368  }
   0x6   :  { %251 = vmatpush3.bf16.msra.mxu1 %v250_v6  ;;  %v253_v9 = vpack.c.bf16 %v112_v8, %v111_v7  ;;  %v221_v10 = vld [vmem:[%s362_s2] ss:$0 sm:$0xff]  ;;  %s290_s2 = smov [#allocation2]  }
   0x7   :  { %252 = vmatprep.subr.bf16.mxu1 %v289_v5  ;;  %v224_v15 = vld [vmem:[%s364_s4] ss:$0 sm:$0xff]  ;;  %s213_s3 = sshll.u32 %s290_s2, 4  ;;  %s214_s3 = int_to_ptr.vmem [resolvable:$true] %s213_s3 }
   0x8   :  { %s263_s4 = scalar_lea.vmem %s214_s3, 32  ;;  %p268_p1 = scmp.lt.s32.totalorder %s214_s3, %s214_s3 }
   0x9   :  { %p264_p0 = scmp.ne.s32.totalorder %s214_s3, %s263_s4  ;;  %p269_p2 = scmp.lt.s32.totalorder %s263_s4, %s263_s4 }
   0xa   :  { %254 = vmatpush3.bf16.msra.mxu1 %v253_v9 }
   0xb   :  { %p270_p3 = por %p269_p2, %p268_p1 }
   0xd   :  { %p271_p4 = pnand %p270_p3, %p264_p0 }
  0xd8   :  { %v104_v11 = vpop.f32.mrb[0].mxu0 }
  0xd9   :  { %v105_v12 = vadd.f32 %v221_v10, %v104_v11  ;;  %v237_v13 = vpop.f32.mrb[1].mxu0 }
  0xdb   :  { %v108_v14 = vmax.f32 %v105_v12, 0.0 }
  0xdd   :  { %247 = vmatmul.mubr.msk.f32.vlgmr.msra.gmra.mrb[0].mxu1 %vm120_vm3, %v108_v14 }
 0x1b0   :  { %v190_v16 = vpop.f32.mrb[0].mxu1 }
 0x1b1   :  { %v191_v17 = vadd.f32 %v224_v15, %v190_v16  ;;  %v248_v18 = vpop.f32.mrb[1].mxu1 }
 0x1b3   :  { %v195_v19 = vsel %vm194_vm4, %v191_v17, -inf }
 0x1b4   :  { %196 = vmax.xlane.f32.xlu0 %v195_v19 }
 0x241   :  { %v197_v20 = vpop.xlane.xlu0 %196 }
 0x242   :  { %v198_v21 = vsub.f32 %v191_v17, %v197_v20 }
 0x244   :  { %v199_v22 = vmul.f32 1.442695, %v198_v21 }
 0x246   :  { %259 = vpow2.f32 %v199_v22 }
 0x250   :  { %v260_v23 = vpop.eup %259 }
 0x251   :  { %v201_v24 = vsel %vm194_vm4, %v260_v23, 0.0 }
 0x252   :  { %202 = vadd.xlane.f32.xlu0 %v201_v24 }
 0x2df   :  { %v203_v25 = vpop.xlane.xlu0 %202 }
 0x2e0   :  { %261 = vrcp.f32 %v203_v25 }
 0x2ea   :  { %v262_v26 = vpop.eup %261 }
 0x2eb   :  { %v205_v27 = vmul.f32 %v262_v26, %v260_v23 }
 0x2ed   :  { %206 = vst.msk [vmem:[#allocation2] sm:$0x3] %vm194_vm4, %v205_v27 }
 0x2ee   :  { %274 = shalt.err (!%p271_p4)
}
 0x2ef   :  { %s275_s9 = scalar_lea.hbm %s365_s5, 32 }
 0x2f0   :  { %p276_p5 = scmp.ne.s32.totalorder %s365_s5, %s275_s9  ;;  %p279_p6 = scmp.lt.u32.totalorder %s275_s9, %s365_s5 }
 0x2f2   :  { %p281_p7 = pnand %p279_p6, %p276_p5 }
 0x2f4   :  { %284 = shalt.err (!%p281_p7)
}
 0x2f5   :  { %216 = dma.vmem_to_hbm [thread:$0]  %s214_s3, 32, %s365_s5, [#allocation3]  }
 0x2f6   :  { %285 = dma.done.wait [#allocation3], 32  }
 0x2f7   :  { %286 = vsyncadd [#allocation3], 4294967264 }
 0x2f8   :  { %220 = vsyncpa [#allocation3], 1 }

</bundles_post_ra>
